<compile_context>
chip_gen: v7x
topology: tpu7x:2x2x1
jax: 0.10.0
libtpu: 0.0.40
codegen_flags: <defaults>
</compile_context>

<pallas_src>
import functools
import math

import jax
import jax.numpy as jnp
import numpy as np
from jax.experimental import pallas as pl
from jax.experimental.pallas import tpu as pltpu

_HALF = 128      # lane width
_COLS = 2 * _HALF


def _round_up(x, m):
    return ((x + m - 1) // m) * m


# ----------------------------------------------------------------------------
# Kernels
# ----------------------------------------------------------------------------
def _sample_kernel(b1_ref, b2_ref, out_ref, *, mean1, mean2, sigma):
    """Mixture samples from raw int32 random bits.

    b1_ref, b2_ref : (TILE_R, 128) int32 random words.
    out_ref        : (TILE_R, 256) float32 samples (lane-dense).
    """
    b1 = b1_ref[...]
    b2 = b2_ref[...]

    inv24 = jnp.float32(1.0 / 16777216.0)  # 2^-24
    # u1 in (0, 1]  (safe for log), u2 in [0, 1) -- from the top 24 bits.
    u1 = (((b1 >> 8) & 0xFFFFFF).astype(jnp.float32) + 1.0) * inv24
    u2 = (((b2 >> 8) & 0xFFFFFF).astype(jnp.float32)) * inv24

    # Paired Box-Muller: one log + one sqrt per TWO outputs.
    r = jnp.float32(sigma) * jnp.sqrt(-2.0 * jnp.log(u1))
    theta = jnp.float32(2.0 * math.pi) * u2
    n_a = r * jnp.cos(theta)
    n_b = r * jnp.sin(theta)

    # Bernoulli(0.5) masks from the discarded low bits of b1 (bits 0 and 1 are
    # independent of the mantissa bits 8..31 used above).
    m1 = jnp.float32(mean1)
    dm = jnp.float32(mean2 - mean1)
    mask_a = (b1 & 1).astype(jnp.float32)
    mask_b = ((b1 >> 1) & 1).astype(jnp.float32)

    # (1-mask)*mean1 + mask*mean2 + noise  ==  mean1 + mask*(mean2-mean1) + noise
    out_ref[:, 0:_HALF] = m1 + mask_a * dm + n_a
    out_ref[:, _HALF:_COLS] = m1 + mask_b * dm + n_b


def _log_prob_kernel(z_ref, out_ref, *, mean1, mean2, sigma):
    """Per-row mixture log-density summed over coordinates (log-sum-exp form)."""
    z = z_ref[...].astype(jnp.float32)                       # (TILE_B, d)
    inv_sigma = jnp.float32(1.0 / sigma)
    log_norm = jnp.float32(math.log(0.5 / (sigma * math.sqrt(2.0 * math.pi))))

    q1 = -0.5 * ((z - jnp.float32(mean1)) * inv_sigma) ** 2
    q2 = -0.5 * ((z - jnp.float32(mean2)) * inv_sigma) ** 2
    qmax = jnp.maximum(q1, q2)
    delta = jnp.abs(q1 - q2)
    log_p = log_norm + qmax + jnp.log1p(jnp.exp(-delta))     # (TILE_B, d)

    out_ref[...] = jnp.sum(log_p, axis=-1, keepdims=True)    # (TILE_B, 1)


# ----------------------------------------------------------------------------
# Python-side wrapper mirroring the nn.Module
# ----------------------------------------------------------------------------
class DWNormalPallas:
    def __init__(self, n_particles, n_dimension, bound, sigma=None):
        self.n_particles = n_particles
        self.n_dimension = n_dimension
        self.bound = float(bound)
        self.sigma = float(sigma) if sigma is not None else self.bound / 8.0
        self.mean1 = -0.5 * self.bound
        self.mean2 = 0.5 * self.bound

    # ---------------- sampling (forward) ----------------
    def sample(self, n_sample, seed=0):
        d = self.n_particles * self.n_dimension
        total = n_sample * d

        # Lane-dense flat layout: samples are i.i.d. per element, so generating
        # a (rows, 256) slab and reshaping afterwards is exactly equivalent.
        rows = pl.cdiv(total, _COLS)
        tile_r = min(512, _round_up(rows, 8))       # ~0.5 MiB f32 output tile
        rows_p = _round_up(rows, tile_r)
        grid = (rows_p // tile_r,)

        key = jax.random.PRNGKey(seed)
        k1, k2 = jax.random.split(key)
        bits1 = jax.lax.bitcast_convert_type(
            jax.random.bits(k1, (rows_p, _HALF), dtype=jnp.uint32), jnp.int32)
        bits2 = jax.lax.bitcast_convert_type(
            jax.random.bits(k2, (rows_p, _HALF), dtype=jnp.uint32), jnp.int32)

        kernel = functools.partial(
            _sample_kernel, mean1=self.mean1, mean2=self.mean2, sigma=self.sigma)

        flat = pl.pallas_call(
            kernel,
            out_shape=jax.ShapeDtypeStruct((rows_p, _COLS), jnp.float32),
            grid=grid,
            in_specs=[pl.BlockSpec((tile_r, _HALF), lambda i: (i, 0)),
                      pl.BlockSpec((tile_r, _HALF), lambda i: (i, 0))],
            out_specs=pl.BlockSpec((tile_r, _COLS), lambda i: (i, 0)),
            compiler_params=pltpu.CompilerParams(
                dimension_semantics=("parallel",)),
            cost_estimate=pl.CostEstimate(
                flops=12 * rows_p * _COLS,
                transcendentals=4 * rows_p * _HALF,
                bytes_accessed=rows_p * (2 * _HALF * 4 + _COLS * 4)),
        )(bits1, bits2)

        return flat.reshape(-1)[:total].reshape(n_sample, d)

    def forward(self, n_sample, seed=0):
        return self.sample(n_sample, seed=seed)

    # ---------------- log_prob ----------------
    def log_prob(self, z):
        b, d = z.shape
        z = z.astype(jnp.float32)

        tile_b = min(512, _round_up(b, 8))
        b_p = _round_up(b, tile_b)
        if b_p != b:
            z = jnp.pad(z, ((0, b_p - b), (0, 0)))
        grid = (b_p // tile_b,)

        kernel = functools.partial(
            _log_prob_kernel, mean1=self.mean1, mean2=self.mean2, sigma=self.sigma)

        out = pl.pallas_call(
            kernel,
            out_shape=jax.ShapeDtypeStruct((b_p, 1), jnp.float32),
            grid=grid,
            in_specs=[pl.BlockSpec((tile_b, d), lambda i: (i, 0))],
            out_specs=pl.BlockSpec((tile_b, 1), lambda i: (i, 0)),
            compiler_params=pltpu.CompilerParams(
                dimension_semantics=("parallel",)),
            cost_estimate=pl.CostEstimate(
                flops=10 * b_p * d,
                transcendentals=2 * b_p * d,
                bytes_accessed=b_p * d * 4 + b_p * 4),
        )(z)
        return out[:b, 0]

    # Pure-JAX reference (same numerically-stable LSE form) for checking.
    def log_prob_ref(self, z):
        z = z.reshape(z.shape[0], self.n_particles, self.n_dimension).astype(jnp.float32)
        log_norm = math.log(0.5 / (self.sigma * math.sqrt(2.0 * math.pi)))
        q1 = -0.5 * ((z - self.mean1) / self.sigma) ** 2
        q2 = -0.5 * ((z - self.mean2) / self.sigma) ** 2
        return (log_norm + jnp.logaddexp(q1, q2)).sum(axis=(1, 2))


if __name__ == "__main__":
    # Small, module-consistent shapes.
    n_particles, n_dimension, bound = 4, 8, 4.0
    n_sample = 16
    d = n_particles * n_dimension

    dist = DWNormalPallas(n_particles, n_dimension, bound)  # sigma = bound/8 = 0.5

    # forward == sample : stochastic path.
    samples = jax.block_until_ready(dist.forward(n_sample, seed=0))
    assert samples.shape == (n_sample, d)
    assert samples.dtype == jnp.float32
    assert bool(jnp.all(jnp.isfinite(samples)))
    # Samples live near one of the two means (+-2) within a few sigma (0.5).
    assert bool(jnp.all(jnp.abs(samples) < bound * 3.0))
    # Both mixture components should be represented.
    assert bool(jnp.any(samples > 0.0)) and bool(jnp.any(samples < 0.0))

    # log_prob : deterministic path, checked against a pure-JAX reference.
    key = jax.random.PRNGKey(0)
    z = (dist.mean1
         + bound * jax.random.uniform(key, (n_sample, d), dtype=jnp.float32))
    lp_kernel = jax.block_until_ready(dist.log_prob(z))
    lp_ref = dist.log_prob_ref(z)
    np.testing.assert_allclose(np.asarray(lp_kernel), np.asarray(lp_ref),
                               rtol=1e-4, atol=1e-4)

    print("KERNEL_OK")
</pallas_src>

<mosaic_0001>
module attributes {stable_mosaic.version = 11 : i64} {
  func.func @_sample_kernel(%arg0: i32, %arg1: memref<8x128xi32, #tpu.memory_space<vmem>>, %arg2: memref<8x128xi32, #tpu.memory_space<vmem>>, %arg3: memref<8x256xf32, #tpu.memory_space<vmem>>) attributes {dimension_semantics = [#tpu.dimension_semantics<parallel>], iteration_bounds = array<i64: 1>, scalar_prefetch = 0 : i64, scratch_operands = 0 : i64, tpu.core_type = #tpu.core_type<tc>, window_params = [{transform_indices = @transform_0, window_bounds = array<i64: 8, 128>}, {transform_indices = @transform_1, window_bounds = array<i64: 8, 128>}, {transform_indices = @transform_2, window_bounds = array<i64: 8, 256>}]} {
    %c0 = arith.constant 0 : index
    %c0_0 = arith.constant 0 : index
    %0 = vector.load %arg1[%c0, %c0_0] : memref<8x128xi32, #tpu.memory_space<vmem>>, vector<8x128xi32>
    %c0_1 = arith.constant 0 : index
    %c0_2 = arith.constant 0 : index
    %1 = vector.load %arg2[%c0_1, %c0_2] : memref<8x128xi32, #tpu.memory_space<vmem>>, vector<8x128xi32>
    %c8_i32 = arith.constant 8 : i32
    %2 = vector.broadcast %c8_i32 : i32 to vector<8x128xi32>
    %3 = arith.shrsi %0, %2 : vector<8x128xi32>
    %c16777215_i32 = arith.constant 16777215 : i32
    %4 = vector.broadcast %c16777215_i32 : i32 to vector<8x128xi32>
    %5 = arith.andi %3, %4 : vector<8x128xi32>
    %6 = arith.sitofp %5 : vector<8x128xi32> to vector<8x128xf32>
    %cst = arith.constant 1.000000e+00 : f32
    %7 = vector.broadcast %cst : f32 to vector<8x128xf32>
    %8 = arith.addf %6, %7 : vector<8x128xf32>
    %cst_3 = arith.constant 5.96046448E-8 : f32
    %9 = vector.broadcast %cst_3 : f32 to vector<8x128xf32>
    %10 = arith.mulf %8, %9 : vector<8x128xf32>
    %c8_i32_4 = arith.constant 8 : i32
    %11 = vector.broadcast %c8_i32_4 : i32 to vector<8x128xi32>
    %12 = arith.shrsi %1, %11 : vector<8x128xi32>
    %c16777215_i32_5 = arith.constant 16777215 : i32
    %13 = vector.broadcast %c16777215_i32_5 : i32 to vector<8x128xi32>
    %14 = arith.andi %12, %13 : vector<8x128xi32>
    %15 = arith.sitofp %14 : vector<8x128xi32> to vector<8x128xf32>
    %cst_6 = arith.constant 5.96046448E-8 : f32
    %16 = vector.broadcast %cst_6 : f32 to vector<8x128xf32>
    %17 = arith.mulf %15, %16 : vector<8x128xf32>
    %18 = math.log %10 : vector<8x128xf32>
    %cst_7 = arith.constant -2.000000e+00 : f32
    %19 = vector.broadcast %cst_7 : f32 to vector<8x128xf32>
    %20 = arith.mulf %19, %18 : vector<8x128xf32>
    %21 = math.sqrt %20 : vector<8x128xf32>
    %cst_8 = arith.constant 5.000000e-01 : f32
    %22 = vector.broadcast %cst_8 : f32 to vector<8x128xf32>
    %23 = arith.mulf %22, %21 : vector<8x128xf32>
    %cst_9 = arith.constant 6.28318548 : f32
    %24 = vector.broadcast %cst_9 : f32 to vector<8x128xf32>
    %25 = arith.mulf %24, %17 : vector<8x128xf32>
    %26 = math.cos %25 : vector<8x128xf32>
    %27 = arith.mulf %23, %26 : vector<8x128xf32>
    %28 = math.sin %25 : vector<8x128xf32>
    %29 = arith.mulf %23, %28 : vector<8x128xf32>
    %c1_i32 = arith.constant 1 : i32
    %30 = vector.broadcast %c1_i32 : i32 to vector<8x128xi32>
    %31 = arith.andi %0, %30 : vector<8x128xi32>
    %32 = arith.sitofp %31 : vector<8x128xi32> to vector<8x128xf32>
    %c1_i32_10 = arith.constant 1 : i32
    %33 = vector.broadcast %c1_i32_10 : i32 to vector<8x128xi32>
    %34 = arith.shrsi %0, %33 : vector<8x128xi32>
    %c1_i32_11 = arith.constant 1 : i32
    %35 = vector.broadcast %c1_i32_11 : i32 to vector<8x128xi32>
    %36 = arith.andi %34, %35 : vector<8x128xi32>
    %37 = arith.sitofp %36 : vector<8x128xi32> to vector<8x128xf32>
    %cst_12 = arith.constant 4.000000e+00 : f32
    %38 = vector.broadcast %cst_12 : f32 to vector<8x128xf32>
    %39 = arith.mulf %32, %38 : vector<8x128xf32>
    %cst_13 = arith.constant -2.000000e+00 : f32
    %40 = vector.broadcast %cst_13 : f32 to vector<8x128xf32>
    %41 = arith.addf %40, %39 : vector<8x128xf32>
    %42 = arith.addf %41, %27 : vector<8x128xf32>
    %c0_14 = arith.constant 0 : index
    %c0_15 = arith.constant 0 : index
    %43 = vector.load %arg3[%c0_14, %c0_15] : memref<8x256xf32, #tpu.memory_space<vmem>>, vector<8x128xf32>
    tpu.vector_store %arg3[%c0_14, %c0_15], %42 {strides = array<i32>} : memref<8x256xf32, #tpu.memory_space<vmem>>, vector<8x128xf32>,
    %cst_16 = arith.constant 4.000000e+00 : f32
    %44 = vector.broadcast %cst_16 : f32 to vector<8x128xf32>
    %45 = arith.mulf %37, %44 : vector<8x128xf32>
    %cst_17 = arith.constant -2.000000e+00 : f32
    %46 = vector.broadcast %cst_17 : f32 to vector<8x128xf32>
    %47 = arith.addf %46, %45 : vector<8x128xf32>
    %48 = arith.addf %47, %29 : vector<8x128xf32>
    %c0_18 = arith.constant 0 : index
    %c128 = arith.constant 128 : index
    %49 = vector.load %arg3[%c0_18, %c128] : memref<8x256xf32, #tpu.memory_space<vmem>>, vector<8x128xf32>
    tpu.vector_store %arg3[%c0_18, %c128], %48 {strides = array<i32>} : memref<8x256xf32, #tpu.memory_space<vmem>>, vector<8x128xf32>,
    return
  }
  func.func @transform_0(%arg0: i32) -> (i32, i32) {
    %c0_i32 = arith.constant 0 : i32
    %c0_i32_0 = arith.constant 0 : i32
    return %arg0, %c0_i32 : i32, i32
  }
  func.func @transform_1(%arg0: i32) -> (i32, i32) {
    %c0_i32 = arith.constant 0 : i32
    %c0_i32_0 = arith.constant 0 : i32
    return %arg0, %c0_i32 : i32, i32
  }
  func.func @transform_2(%arg0: i32) -> (i32, i32) {
    %c0_i32 = arith.constant 0 : i32
    %c0_i32_0 = arith.constant 0 : i32
    return %arg0, %c0_i32 : i32, i32
  }
}

</mosaic_0001>

<bundles_post_ra>
// kernel: tpu_custom_call.1
= control target key start
LH: loop header
LB: loop body
LE: loop exit
PB: predicated region body
PF: predicated region fallthrough
CT: control target
= control target key end

     0   :  { %7 = vsyncpa [#allocation3], 0  ;;  %s489_s0 = inlined_call_operand.hbm [shape: s32[8,128], index: 0, kind: input, shape index: {}]   ;;  %s490_s1 = inlined_call_operand.hbm [shape: s32[8,128], index: 1, kind: input, shape index: {}]   ;;  %s491_s2 = inlined_call_operand.hbm [shape: f32[8,256], index: 2, kind: output, shape index: {}]  }
   0x1   :  { %8 = vsyncpa [#allocation6], 0 }
   0x2   :  { %9 = vsyncpa [#allocation4], 0  ;;  %s400_s9 = smov [#allocation2]   ;;  %s401_s11 = smov [#allocation5]  }
   0x3   :  { %s16_s10 = sshll.u32 %s400_s9, 4  ;;  %s26_s12 = sshll.u32 %s401_s11, 4  ;;  %s17_s10 = int_to_ptr.vmem [resolvable:$true] %s16_s10  ;;  %s27_s12 = int_to_ptr.vmem [resolvable:$true] %s26_s12 }
   0x4   :  { %s328_s15 = scalar_lea.hbm %s489_s0, 128 }
   0x5   :  { %p329_p0 = scmp.ne.s32.totalorder %s489_s0, %s328_s15  ;;  %p332_p1 = scmp.lt.u32.totalorder %s328_s15, %s489_s0 }
   0x7   :  { %p334_p2 = pnand %p332_p1, %p329_p0 }
   0x9   :  { %337 = shalt.err (!%p334_p2)
}
   0xa   :  { %s338_s20 = scalar_lea.vmem %s17_s10, 128  ;;  %p343_p4 = scmp.lt.s32.totalorder %s17_s10, %s17_s10 }
   0xb   :  { %p339_p3 = scmp.ne.s32.totalorder %s17_s10, %s338_s20  ;;  %p344_p5 = scmp.lt.s32.totalorder %s338_s20, %s338_s20 }
   0xd   :  { %p345_p6 = por %p344_p5, %p343_p4 }
   0xf   :  { %p346_p7 = pnand %p345_p6, %p339_p3 }
  0x11   :  { %349 = shalt.err (!%p346_p7)
}
  0x12   :  { %19 = dma.hbm_to_vmem [thread:$0]  %s489_s0, 128, %s17_s10, [#allocation3]  }
  0x13   :  { %s350_s25 = scalar_lea.hbm %s490_s1, 128 }
  0x14   :  { %p351_p8 = scmp.ne.s32.totalorder %s490_s1, %s350_s25  ;;  %p354_p9 = scmp.lt.u32.totalorder %s350_s25, %s490_s1 }
  0x16   :  { %p356_p10 = pnand %p354_p9, %p351_p8 }
  0x18   :  { %359 = shalt.err (!%p356_p10)
}
  0x19   :  { %s360_s30 = scalar_lea.vmem %s27_s12, 128  ;;  %p365_p12 = scmp.lt.s32.totalorder %s27_s12, %s27_s12 }
  0x1a   :  { %p361_p11 = scmp.ne.s32.totalorder %s27_s12, %s360_s30  ;;  %p366_p13 = scmp.lt.s32.totalorder %s360_s30, %s360_s30 }
  0x1c   :  { %p367_p0 = por %p366_p13, %p365_p12 }
  0x1e   :  { %p368_p1 = pnand %p367_p0, %p361_p11 }
  0x20   :  { %371 = shalt.err (!%p368_p1)
}
  0x21   :  { %29 = dma.hbm_to_vmem [thread:$0]  %s490_s1, 128, %s27_s12, [#allocation6]  }
  0x22   :  { %394 = dma.done.wait [#allocation3], 128  }
  0x23   :  { %395 = vsyncadd [#allocation3], 4294967168 }
  0x24   :  { %396 = dma.done.wait [#allocation6], 128  }
  0x25   :  { %397 = vsyncadd [#allocation6], 4294967168  ;;  %v37_v0 = vld [vmem:[#allocation5] sm:$0xff]  ;;  %v402_v15 = vmov 683565275   ;;  %v454_v26 = vld [vmem:[#allocation2] sm:$0xff] }
  0x26   :  { %v298_v1 = vshrl.u32 %v37_v0, 8  ;;  %v403_v17 = vmov 2475754826   ;;  %v404_v19 = vmov 2131351028   ;;  %v297_v37 = vshrl.u32 %v454_v26, 8 }
  0x27   :  { %v405_v23 = vmov 2102212464   ;;  %v406_v29 = vmov 920167782   ;;  %v407_v35 = vmov 1326507024  }
  0x28   :  { %v45_v2 = vcvt.s32.f32 %v298_v1  ;;  %v40_v49 = vcvt.s32.f32 %v297_v37  ;;  %s408_s1 = smov [#allocation7]  }
  0x29   :  { %s287_s4 = sshll.u32 %s408_s1, 4  ;;  %s288_s4 = int_to_ptr.vmem [resolvable:$true] %s287_s4 }
  0x2a   :  { %v46_v3 = vmul.f32 5.9604645e-08, %v45_v2  ;;  %v41_v59 = vadd.f32 1.0, %v40_v49  ;;  %s372_s5 = scalar_lea.vmem %s288_s4, 256  ;;  %p377_p3 = scmp.lt.s32.totalorder %s288_s4, %s288_s4 }
  0x2b   :  { %p373_p2 = scmp.ne.s32.totalorder %s288_s4, %s372_s5  ;;  %p378_p4 = scmp.lt.s32.totalorder %s372_s5, %s372_s5 }
  0x2c   :  { %v448_v4 = vmul.f32 6.2831855, %v46_v3  ;;  %v42_v63 = vmul.f32 5.9604645e-08, %v41_v59 }
  0x2d   :  { %p379_p5 = por %p378_p4, %p377_p3 }
  0x2e   :  { %v62_v5 = vand.u32 2139095040, %v448_v4  ;;  %v59_v9 = vand.u32 2147483647, %v448_v4  ;;  %320 = vlog2.f32 %v42_v63  ;;  %vm61_vm7 = vcmp.lt.s32.totalorder %v448_v4, 0 }
  0x2f   :  { %p380_p6 = pnand %p379_p5, %p373_p2 }
  0x30   :  { %v63_v6 = vshrl.u32 %v62_v5, 23  ;;  %v66_v12 = vand.u32 8388607, %v59_v9  ;;  %vm60_vm8 = vcmp.le.f32.partialorder %v59_v9, 0.7853982 }
  0x32   :  { %v299_v7 = vadd.s32 4294967169, %v63_v6  ;;  %v67_v27 = vor.u32 8388608, %v66_v12 }
  0x34   :  { %v69_v8 = vadd.s32 1, %v299_v7  ;;  %v107_v42 = vshll.u32 %v67_v27, 8 }
  0x36   :  { %vm70_vm0 = vcmp.gt.s32.totalorder %v69_v8, 0 }
  0x37   :  { %v71_v10 = vsel %vm70_vm0, %v69_v8, 0 }
  0x38   :  { %v73_v11 = vand.u32 31, %v71_v10  ;;  %v72_v13 = vshrl.u32 %v71_v10, 5  ;;  %v321_v8 = vpop.eup %320 }
  0x3a   :  { %v74_v14 = vsub.s32 32, %v73_v11  ;;  %v76_v16 = vshll.u32 %v402_v15, %v73_v11  ;;  %v79_v18 = vshll.u32 %v403_v17, %v73_v11  ;;  %v82_v20 = vshll.u32 %v404_v19, %v73_v11 }
  0x3b   :  { %v85_v25 = vshll.u32 %v405_v23, %v73_v11  ;;  %v88_v30 = vshll.u32 %v406_v29, %v73_v11  ;;  %vm91_vm1 = vcmp.lt.s32.totalorder %v72_v13, 1  ;;  %vm94_vm2 = vcmp.lt.s32.totalorder %v72_v13, 4 }
  0x3c   :  { %v77_v21 = vshrl.u32 %v403_v17, %v74_v14  ;;  %v80_v22 = vshrl.u32 %v404_v19, %v74_v14  ;;  %v83_v24 = vshrl.u32 %v405_v23, %v74_v14  ;;  %v75_v28 = vshrl.u32 %v402_v15, %v74_v14 }
  0x3d   :  { %v86_v34 = vshrl.u32 %v406_v29, %v74_v14  ;;  %v89_v36 = vshrl.u32 %v407_v35, %v74_v14  ;;  %vm93_vm3 = vcmp.lt.s32.totalorder %v72_v13, 3  ;;  %vm92_vm4 = vcmp.lt.s32.totalorder %v72_v13, 2 }
  0x3e   :  { %v78_v31 = vor.u32 %v77_v21, %v76_v16  ;;  %v81_v32 = vor.u32 %v80_v22, %v79_v18  ;;  %v84_v33 = vor.u32 %v83_v24, %v82_v20  ;;  %v48_v11 = vmul.f32 0.6931472, %v321_v8 }
  0x3f   :  { %v87_v38 = vor.u32 %v86_v34, %v85_v25  ;;  %v90_v40 = vor.u32 %v89_v36, %v88_v30  ;;  %v268_v35 = vand.u32 1, %v454_v26 }
  0x40   :  { %v96_v39 = vsel %vm94_vm2, %v84_v33, 2102212464  ;;  %v99_v41 = vsel %vm91_vm1, %v78_v31, %v81_v32  ;;  %v95_v43 = vsel %vm91_vm1, %v75_v28, %v78_v31  ;;  %v103_v46 = vsel %vm91_vm1, %v81_v32, %v84_v33 }
  0x41   :  { %v97_v44 = vsel %vm93_vm3, %v81_v32, %v96_v39  ;;  %v100_v45 = vsel %vm94_vm2, %v87_v38, 920167782  ;;  %v104_v48 = vsel %vm94_vm2, %v90_v40, 1326507024  ;;  %v49_v17 = vmul.f32 -2.0, %v48_v11 }
  0x42   :  { %v101_v47 = vsel %vm93_vm3, %v84_v33, %v100_v45  ;;  %v105_v51 = vsel %vm93_vm3, %v87_v38, %v104_v48  ;;  %v98_v52 = vsel %vm92_vm4, %v95_v43, %v97_v44  ;;  %v270_v33 = vshra.s32 %v454_v26, 1 }
  0x43   :  { %v102_v50 = vsel %vm92_vm4, %v99_v41, %v101_v47  ;;  %v106_v53 = vsel %vm92_vm4, %v103_v46, %v105_v51  ;;  %v114_v58 = vmul.u32 %v107_v42, %v98_v52  ;;  %322 = vrsqrt.f32 %v49_v17 }
  0x44   :  { %v460_v54 = vmul.u32.u64.low %v107_v42, %v102_v50  ;;  %v461_v55 = vmul.u32.u64.high %v107_v42, %v102_v50, %v460_v54  ;;  %v463_v56 = vmul.u32.u64.low %v107_v42, %v106_v53  ;;  %v464_v57 = vmul.u32.u64.high %v107_v42, %v106_v53, %v463_v56 }
  0x45   :  { %v271_v38 = vand.u32 1, %v270_v33  ;;  %vm52_vm9 = vcmp.eq.f32.partialorder %v49_v17, inf  ;;  %v55_v39 = vand.u32 2147483648, %v49_v17  ;;  %v269_v9 = vcvt.s32.f32 %v268_v35 }
  0x46   :  { %v117_v60 = vadd.s32 1, %v461_v55  ;;  %vm116_vm5 = vc.u32 %v464_v57, %v460_v54  ;;  %v115_v12 = vadd.s32 %v460_v54, %v464_v57  ;;  %vm54_vm10 = vcmp.eq.f32.partialorder %v49_v17, 0.0 }
  0x47   :  { %v272_v43 = vcvt.s32.f32 %v271_v38  ;;  %v273_v46 = vmul.f32 4.0, %v269_v9  ;;  %vm151_vm1 = vweird.f32 %v448_v4 }
  0x48   :  { %v118_v61 = vsel %vm116_vm5, %v117_v60, %v461_v55 }
  0x49   :  { %v119_v62 = vadd.s32 %v118_v61, %v114_v58  ;;  %v277_v26 = vmul.f32 4.0, %v272_v43  ;;  %v274_v56 = vadd.f32 -2.0, %v273_v46 }
  0x4b   :  { %v120_v0 = vadd.s32 536870912, %v119_v62  ;;  %v278_v58 = vadd.f32 -2.0, %v277_v26 }
  0x4d   :  { %v121_v1 = vshrl.u32 %v120_v0, 30  ;;  %v323_v34 = vpop.eup %322 }
  0x4e   :  { %v51_v37 = vmul.f32 %v323_v34, %v49_v17 }
  0x4f   :  { %v122_v2 = vshll.u32 %v121_v1, 30  ;;  %v145_v25 = vsub.s32 4, %v121_v1 }
  0x50   :  { %v53_v42 = vsel %vm52_vm9, %v49_v17, %v51_v37 }
  0x51   :  { %v123_v3 = vsub.s32 %v119_v62, %v122_v2  ;;  %v146_v29 = vsel %vm61_vm7, %v145_v25, %v121_v1  ;;  %v56_v45 = vsel %vm54_vm10, %v55_v39, %v53_v42 }
  0x52   :  { %v148_v32 = vsel %vm60_vm8, 0, %v146_v29  ;;  %v57_v50 = vmul.f32 0.5, %v56_v45 }
  0x53   :  { %v125_v5 = vsub.s32 0, %v123_v3  ;;  %v256_v36 = vadd.s32 3, %v148_v32  ;;  %v152_v40 = vand.u32 3, %v148_v32 }
  0x55   :  { %v300_v6 = vmin.u32 %v125_v5, %v123_v3  ;;  %v257_v41 = vand.u32 3, %v256_v36  ;;  %vm157_vm11 = vcmp.eq.s32.totalorder %v152_v40, 2  ;;  %vm154_vm13 = vcmp.eq.s32.totalorder %v152_v40, 0 }
  0x56   :  { %vm153_vm15 = vcmp.lt.s32.totalorder %v152_v40, 2 }
  0x57   :  { %v127_v7 = vclz %v300_v6  ;;  %vm262_vm12 = vcmp.eq.s32.totalorder %v257_v41, 2  ;;  %vm259_vm14 = vcmp.eq.s32.totalorder %v257_v41, 0  ;;  %vm258_vm0 = vcmp.lt.s32.totalorder %v257_v41, 2 }
  0x59   :  { %v301_v10 = vadd.s32 4294967294, %v127_v7 }
  0x5b   :  { %vm302_vm6 = vcmp.lt.s32.totalorder %v301_v10, 0 }
  0x5c   :  { %v130_v13 = vsel %vm302_vm6, 0, %v301_v10 }
  0x5d   :  { %v131_v14 = vsub.s32 32, %v130_v13  ;;  %v132_v15 = vshll.u32 %v123_v3, %v130_v13  ;;  %v135_v16 = vsub.s32 4294967266, %v130_v13 }
  0x5f   :  { %v133_v18 = vshrl.u32 %v115_v12, %v131_v14  ;;  %v136_v19 = vadd.s32 127, %v135_v16 }
  0x61   :  { %v134_v20 = vor.u32 %v133_v18, %v132_v15  ;;  %v137_v21 = vshll.u32 %v136_v19, 23 }
  0x63   :  { %v138_v22 = vor.u32 4788187, %v137_v21  ;;  %v141_v23 = vcvt.s32.f32 %v134_v20 }
  0x65   :  { %v139_v24 = vand.u32 2147483647, %v138_v22 }
  0x67   :  { %v142_v27 = vmul.f32 %v141_v23, %v139_v24 }
  0x69   :  { %v143_v28 = vxor.u32 2147483648, %v142_v27 }
  0x6b   :  { %v144_v30 = vsel %vm61_vm7, %v143_v28, %v142_v27 }
  0x6c   :  { %v147_v31 = vsel %vm60_vm8, %v448_v4, %v144_v30 }
  0x6d   :  { %324 = vcosq.f32 %v147_v31 }
  0x6e   :  { %326 = vsinq.f32 %v147_v31 }
  0x77   :  { %v325_v44 = vpop.eup %324 }
  0x78   :  { %v327_v47 = vpop.eup %326  ;;  %v158_v48 = vxor.u32 2147483648, %v325_v44 }
  0x79   :  { %v155_v49 = vxor.u32 2147483648, %v327_v47 }
  0x7a   :  { %v159_v51 = vsel %vm157_vm11, %v158_v48, %v327_v47  ;;  %v264_v52 = vsel %vm262_vm12, %v158_v48, %v327_v47 }
  0x7b   :  { %v156_v53 = vsel %vm154_vm13, %v325_v44, %v155_v49  ;;  %v261_v54 = vsel %vm259_vm14, %v325_v44, %v155_v49 }
  0x7c   :  { %v160_v55 = vsel %vm153_vm15, %v156_v53, %v159_v51  ;;  %v265_v57 = vsel %vm258_vm0, %v261_v54, %v264_v52 }
  0x7d   :  { %v161_v59 = vsel %vm151_vm1, nan, %v160_v55  ;;  %v266_v60 = vsel %vm151_vm1, nan, %v265_v57 }
  0x7e   :  { %v162_v61 = vmul.f32 %v161_v59, %v57_v50  ;;  %v267_v62 = vmul.f32 %v266_v60, %v57_v50 }
  0x80   :  { %v275_v63 = vadd.f32 %v274_v56, %v162_v61  ;;  %v279_v0 = vadd.f32 %v278_v58, %v267_v62 }
  0x82   :  { %276 = vst [vmem:[#allocation7] sm:$0xff] %v275_v63  ;;  %280 = vst [vmem:[#allocation7 + $0x8] sm:$0xff] %v279_v0 }
  0x83   :  { %383 = shalt.err (!%p380_p6)
}
  0x84   :  { %s384_s8 = scalar_lea.hbm %s491_s2, 256 }
  0x85   :  { %p385_p7 = scmp.ne.s32.totalorder %s491_s2, %s384_s8  ;;  %p388_p8 = scmp.lt.u32.totalorder %s384_s8, %s491_s2 }
  0x87   :  { %p390_p9 = pnand %p388_p8, %p385_p7 }
  0x89   :  { %393 = shalt.err (!%p390_p9)
}
  0x8a   :  { %290 = dma.vmem_to_hbm [thread:$0]  %s288_s4, 256, %s491_s2, [#allocation4]  }
  0x8b   :  { %398 = dma.done.wait [#allocation4], 256  }
  0x8c   :  { %399 = vsyncadd [#allocation4], 4294967040 }
  0x8d   :  { %294 = vsyncpa [#allocation3], 1 }
  0x8e   :  { %295 = vsyncpa [#allocation6], 1 }
  0x8f   :  { %296 = vsyncpa [#allocation4], 1 }

</bundles_post_ra>
